<compile_context>
chip_gen: v7x
topology: tpu7x:2x2x1
jax: 0.10.0
libtpu: 0.0.40
codegen_flags: <defaults>
</compile_context>

<pallas_src>
import functools

import jax
import jax.numpy as jnp
from jax import lax
from jax.experimental import pallas as pl
from jax.experimental.pallas import tpu as pltpu

LANES = 128
TILE_ROWS = 2048        # (2048, 128) f32 tile = 1 MiB per input
NUM_CORE_SPLITS = 2     # leading "parallel" grid axis (both TCs on v7x)


def _aleatoric_loss_kernel(gt_ref, pred_ref, lv_ref, out_ref, acc_ref, *,
                           block_rows, tiles_per_core, valid_rows, needs_mask):
    i = pl.program_id(1)   # reduction ("arbitrary") axis

    @pl.when(i == 0)
    def _init():
        acc_ref[...] = jnp.zeros_like(acc_ref)

    gt = gt_ref[...].astype(jnp.float32)
    pred = pred_ref[...].astype(jnp.float32)
    lv = lv_ref[...].astype(jnp.float32)

    diff = gt - pred
    # Unscaled term; the 0.5 factor is applied once to the final scalar.
    tile = jnp.exp(-lv) * (diff * diff) + lv

    if needs_mask:
        # Mask rows past the end of the real data (partial last block and/or
        # fully-out-of-range logical tiles that the index_map clamped).
        c = pl.program_id(0)
        logical_block = c * tiles_per_core + i          # unclamped tile id
        row0 = logical_block * block_rows
        row = row0 + lax.broadcasted_iota(jnp.int32, tile.shape, 0)
        tile = jnp.where(row < valid_rows, tile, 0.0)

    # Vector accumulate: keep per-step work on the VPU add slots; the single
    # cross-lane reduction of the (8, 128) partial is done outside the kernel.
    acc_ref[...] += tile.reshape(-1, 8, LANES).sum(axis=0)

    @pl.when(i == pl.num_programs(1) - 1)
    def _flush():
        out_ref[...] = acc_ref[...]


def aleatoric_loss(gt, pred_y, logvar):
    """Returns a scalar float32 loss, matching the PyTorch forward exactly."""
    assert gt.shape == pred_y.shape == logvar.shape

    n = gt.size
    rows = (n + LANES - 1) // LANES
    padded_n = rows * LANES

    def _prep(x):
        x = jnp.ravel(x)                       # keep native dtype (no astype)
        if padded_n != n:
            # Only hit for non-128-aligned sizes; zeros contribute 0 to the
            # unscaled term (exp(0)*0 + 0 = 0).
            x = jnp.pad(x, (0, padded_n - n))
        return x.reshape(rows, LANES)

    gt2, pred2, lv2 = _prep(gt), _prep(pred_y), _prep(logvar)

    block_rows = min(TILE_ROWS, ((rows + 7) // 8) * 8)
    n_tiles = (rows + block_rows - 1) // block_rows
    tiles_per_core = (n_tiles + NUM_CORE_SPLITS - 1) // NUM_CORE_SPLITS
    # Mask needed unless the grid covers the rows exactly with no leftovers.
    needs_mask = NUM_CORE_SPLITS * tiles_per_core * block_rows != rows

    def in_index(c, i):
        # Clamp fully-out-of-range logical tiles onto the last valid block;
        # their contribution is masked to zero inside the kernel.
        blk = jnp.minimum(c * tiles_per_core + i, n_tiles - 1)
        return (blk, 0)

    in_spec = pl.BlockSpec((block_rows, LANES), in_index)

    kernel = functools.partial(
        _aleatoric_loss_kernel,
        block_rows=block_rows,
        tiles_per_core=tiles_per_core,
        valid_rows=rows,
        needs_mask=needs_mask,
    )

    partials = pl.pallas_call(
        kernel,
        out_shape=jax.ShapeDtypeStruct((NUM_CORE_SPLITS * 8, LANES), jnp.float32),
        grid_spec=pltpu.PrefetchScalarGridSpec(
            num_scalar_prefetch=0,
            grid=(NUM_CORE_SPLITS, tiles_per_core),
            in_specs=[in_spec, in_spec, in_spec],
            out_specs=pl.BlockSpec((8, LANES), lambda c, i: (c, 0)),
            scratch_shapes=[pltpu.VMEM((8, LANES), jnp.float32)],
        ),
        compiler_params=pltpu.CompilerParams(
            dimension_semantics=("parallel", "arbitrary"),
        ),
    )(gt2, pred2, lv2)

    # Tiny (2*8, 128) final reduction in plain JAX; apply the 0.5 scale once.
    return 0.5 * jnp.sum(partials)


if __name__ == "__main__":
    key = jax.random.PRNGKey(0)
    k_gt, k_pred, k_lv = jax.random.split(key, 3)

    shape = (2, 4, 16, 16)  # NCHW, small
    gt = jax.random.normal(k_gt, shape, dtype=jnp.float32)
    pred_y = jax.random.normal(k_pred, shape, dtype=jnp.float32)
    logvar = 0.5 * jax.random.normal(k_lv, shape, dtype=jnp.float32)

    loss = aleatoric_loss(gt, pred_y, logvar)
    loss = jax.block_until_ready(loss)

    # reference check in plain JAX
    ref = jnp.sum(0.5 * jnp.exp(-logvar) * (gt - pred_y) ** 2 + 0.5 * logvar)
    assert jnp.allclose(loss, ref, rtol=1e-5, atol=1e-5), (loss, ref)

    print("KERNEL_OK")
</pallas_src>

<mosaic_0001>
module attributes {stable_mosaic.version = 11 : i64} {
  func.func @_aleatoric_loss_kernel(%arg0: i32, %arg1: i32, %arg2: memref<16x128xf32, #tpu.memory_space<vmem>>, %arg3: memref<16x128xf32, #tpu.memory_space<vmem>>, %arg4: memref<16x128xf32, #tpu.memory_space<vmem>>, %arg5: memref<8x128xf32, #tpu.memory_space<vmem>>, %arg6: memref<8x128xf32, #tpu.memory_space<vmem>>) attributes {dimension_semantics = [#tpu.dimension_semantics<parallel>, #tpu.dimension_semantics<arbitrary>], iteration_bounds = array<i64: 2, 1>, scalar_prefetch = 0 : i64, scratch_operands = 1 : i64, tpu.core_type = #tpu.core_type<tc>, window_params = [{transform_indices = @transform_0, window_bounds = array<i64: 16, 128>}, {transform_indices = @transform_1, window_bounds = array<i64: 16, 128>}, {transform_indices = @transform_2, window_bounds = array<i64: 16, 128>}, {transform_indices = @transform_3, window_bounds = array<i64: 8, 128>}]} {
    %c0_i32 = arith.constant 0 : i32
    %0 = arith.cmpi eq, %arg1, %c0_i32 : i32
    %1 = arith.extui %0 : i1 to i32
    %c0_i32_0 = arith.constant 0 : i32
    %2 = arith.cmpi ne, %1, %c0_i32_0 : i32
    scf.if %2 {
      %cst_15 = arith.constant 0.000000e+00 : f32
      %31 = vector.broadcast %cst_15 : f32 to vector<8x128xf32>
      %c0_16 = arith.constant 0 : index
      %c0_17 = arith.constant 0 : index
      %32 = vector.load %arg6[%c0_16, %c0_17] : memref<8x128xf32, #tpu.memory_space<vmem>>, vector<8x128xf32>
      tpu.vector_store %arg6[%c0_16, %c0_17], %31 {strides = array<i32>} : memref<8x128xf32, #tpu.memory_space<vmem>>, vector<8x128xf32>,
    } else {
    }
    %c0 = arith.constant 0 : index
    %c0_1 = arith.constant 0 : index
    %3 = vector.load %arg2[%c0, %c0_1] : memref<16x128xf32, #tpu.memory_space<vmem>>, vector<16x128xf32>
    %c0_2 = arith.constant 0 : index
    %c0_3 = arith.constant 0 : index
    %4 = vector.load %arg3[%c0_2, %c0_3] : memref<16x128xf32, #tpu.memory_space<vmem>>, vector<16x128xf32>
    %c0_4 = arith.constant 0 : index
    %c0_5 = arith.constant 0 : index
    %5 = vector.load %arg4[%c0_4, %c0_5] : memref<16x128xf32, #tpu.memory_space<vmem>>, vector<16x128xf32>
    %6 = arith.subf %3, %4 : vector<16x128xf32>
    %cst = arith.constant 0.000000e+00 : f32
    %7 = vector.broadcast %cst : f32 to vector<16x128xf32>
    %8 = arith.subf %7, %5 : vector<16x128xf32>
    %9 = math.exp %8 : vector<16x128xf32>
    %10 = arith.mulf %6, %6 : vector<16x128xf32>
    %11 = arith.mulf %9, %10 : vector<16x128xf32>
    %12 = arith.addf %11, %5 : vector<16x128xf32>
    %c1_i32 = arith.constant 1 : i32
    %13 = arith.muli %arg0, %c1_i32 : i32
    %14 = arith.addi %13, %arg1 : i32
    %c16_i32 = arith.constant 16 : i32
    %15 = arith.muli %14, %c16_i32 : i32
    %16 = tpu.iota {dimensions = array<i32: 0>} : vector<16x128xi32>
    %17 = vector.broadcast %15 : i32 to vector<16x128xi32>
    %18 = arith.addi %17, %16 : vector<16x128xi32>
    %c16_i32_6 = arith.constant 16 : i32
    %19 = vector.broadcast %c16_i32_6 : i32 to vector<16x128xi32>
    %20 = arith.cmpi slt, %18, %19 : vector<16x128xi32>
    %cst_7 = arith.constant 0.000000e+00 : f32
    %21 = vector.broadcast %cst_7 : f32 to vector<16x128xf32>
    %22 = arith.select %20, %12, %21 : vector<16x128xi1>, vector<16x128xf32>
    %c0_8 = arith.constant 0 : index
    %c0_9 = arith.constant 0 : index
    %23 = vector.load %arg6[%c0_8, %c0_9] : memref<8x128xf32, #tpu.memory_space<vmem>>, vector<8x128xf32>
    %24 = vector.shape_cast %22 : vector<16x128xf32> to vector<2x8x128xf32>
    %cst_10 = arith.constant dense<0.000000e+00> : vector<8x128xf32>
    %25 = vector.multi_reduction <add>, %24, %cst_10 [0] : vector<2x8x128xf32> to vector<8x128xf32>
    %26 = arith.addf %23, %25 : vector<8x128xf32>
    %c0_11 = arith.constant 0 : index
    %c0_12 = arith.constant 0 : index
    %27 = vector.load %arg6[%c0_11, %c0_12] : memref<8x128xf32, #tpu.memory_space<vmem>>, vector<8x128xf32>
    tpu.vector_store %arg6[%c0_11, %c0_12], %26 {strides = array<i32>} : memref<8x128xf32, #tpu.memory_space<vmem>>, vector<8x128xf32>,
    %c0_i32_13 = arith.constant 0 : i32
    %28 = arith.cmpi eq, %arg1, %c0_i32_13 : i32
    %29 = arith.extui %28 : i1 to i32
    %c0_i32_14 = arith.constant 0 : i32
    %30 = arith.cmpi ne, %29, %c0_i32_14 : i32
    scf.if %30 {
      %c0_15 = arith.constant 0 : index
      %c0_16 = arith.constant 0 : index
      %31 = vector.load %arg6[%c0_15, %c0_16] : memref<8x128xf32, #tpu.memory_space<vmem>>, vector<8x128xf32>
      %c0_17 = arith.constant 0 : index
      %c0_18 = arith.constant 0 : index
      %32 = vector.load %arg5[%c0_17, %c0_18] : memref<8x128xf32, #tpu.memory_space<vmem>>, vector<8x128xf32>
      tpu.vector_store %arg5[%c0_17, %c0_18], %31 {strides = array<i32>} : memref<8x128xf32, #tpu.memory_space<vmem>>, vector<8x128xf32>,
    } else {
    }
    return
  }
  func.func @transform_0(%arg0: i32, %arg1: i32) -> (i32, i32) {
    %c1_i32 = arith.constant 1 : i32
    %0 = arith.muli %arg0, %c1_i32 : i32
    %1 = arith.addi %0, %arg1 : i32
    %c0_i32 = arith.constant 0 : i32
    %2 = arith.minsi %1, %c0_i32 : i32
    %c0_i32_0 = arith.constant 0 : i32
    %c0_i32_1 = arith.constant 0 : i32
    return %2, %c0_i32_0 : i32, i32
  }
  func.func @transform_1(%arg0: i32, %arg1: i32) -> (i32, i32) {
    %c1_i32 = arith.constant 1 : i32
    %0 = arith.muli %arg0, %c1_i32 : i32
    %1 = arith.addi %0, %arg1 : i32
    %c0_i32 = arith.constant 0 : i32
    %2 = arith.minsi %1, %c0_i32 : i32
    %c0_i32_0 = arith.constant 0 : i32
    %c0_i32_1 = arith.constant 0 : i32
    return %2, %c0_i32_0 : i32, i32
  }
  func.func @transform_2(%arg0: i32, %arg1: i32) -> (i32, i32) {
    %c1_i32 = arith.constant 1 : i32
    %0 = arith.muli %arg0, %c1_i32 : i32
    %1 = arith.addi %0, %arg1 : i32
    %c0_i32 = arith.constant 0 : i32
    %2 = arith.minsi %1, %c0_i32 : i32
    %c0_i32_0 = arith.constant 0 : i32
    %c0_i32_1 = arith.constant 0 : i32
    return %2, %c0_i32_0 : i32, i32
  }
  func.func @transform_3(%arg0: i32, %arg1: i32) -> (i32, i32) {
    %c0_i32 = arith.constant 0 : i32
    %c0_i32_0 = arith.constant 0 : i32
    return %arg0, %c0_i32 : i32, i32
  }
}

</mosaic_0001>

<bundles_post_ra>
// kernel: tpu_custom_call.1
= control target key start
LH: loop header
LB: loop body
LE: loop exit
PB: predicated region body
PF: predicated region fallthrough
CT: control target
= control target key end

     0   :  { %s1096_s0 = inlined_call_operand.hbm [shape: f32[16,128], index: 0, kind: input, shape index: {}]   ;;  %s1097_s1 = inlined_call_operand.hbm [shape: f32[16,128], index: 1, kind: input, shape index: {}]   ;;  %s1098_s2 = inlined_call_operand.hbm [shape: f32[16,128], index: 2, kind: input, shape index: {}]   ;;  %s1099_s3 = inlined_call_operand.hbm [shape: f32[16,128], index: 3, kind: output, shape index: {}]  }
   0x1   :  { %1106 = sst [smem:[#allocation16_spill]] %s1097_s1 }
   0x2   :  { %8 = vsyncpa [#allocation4], 0 }
   0x3   :  { %10 = vsyncpa [#allocation4 + $0x1], 0 }
   0x4   :  { %11 = vsyncpa [#allocation7], 0 }
   0x5   :  { %13 = vsyncpa [#allocation7 + $0x1], 0 }
   0x6   :  { %14 = vsyncpa [#allocation5], 0 }
   0x7   :  { %16 = vsyncpa [#allocation5 + $0x1], 0  ;;  %s851_s12 = smov 0   ;;  %s853_s13 = smov 0  }
   0x8   :  { %s855_s14 = smov 0   ;;  %s857_s15 = smov 0  }
   0x9   :  { %s859_s16 = smov 0   ;;  %s861_s17 = smov 0  }
   0xa   :  { %s863_s18 = smov 0   ;;  %s865_s19 = smov 0  }
   0xb LB: > { %1107 = sst [smem:[#allocation13_spill]] %s819_s18  ;;  %s890_s20 = sadd.s32 4294967295, %s823_s19   ;;  %s823_s19 = sphi %s865_s19, %s22_s19   ;;  %s819_s18 = sphi %s863_s18, %s1128_s18   ;;  %s815_s17 = sphi %s861_s17, %s1127_s17   ;;  %s811_s16 = sphi %s859_s16, %s1086_s16   ;;  %s807_s15 = sphi %s857_s15, %s1132_s15   ;;  %s803_s14 = sphi %s855_s14, %s1131_s14   ;;  %s799_s13 = sphi %s853_s13, %s1130_s13   ;;  %s795_s12 = sphi %s851_s12, %s1129_s12  }
   0xc   : > { %s499_s21 = sadd.s32 4294967294, %s823_s19   ;;  %s34_s22 = sadd.s32 1, %s819_s18 }
   0xd   : > { %p36_p0 = scmp.ge.s32.totalorder %s34_s22, 2  ;;  %p792_p1 = scmp.ne.s32.totalorder %s811_s16, 0 }
   0xe   : > { %p55_p2 = scmp.eq.s32.totalorder %s823_s19, 0  ;;  %p60_p3 = scmp.ne.s32.totalorder %s811_s16, %s807_s15 }
   0xf   : > { %s1134_s22 = smov (%p36_p0, %s34_s22), 0  ;;  %p61_p5 = scmp.eq.s32.totalorder %s890_s20, 0 }
  0x10   : > { %1108 = sst [smem:[#allocation14_spill]] %s1134_s22  ;;  %p899_p4 = por %p792_p1, %p55_p2 }
  0x11   : > { %p904_p6 = por %p61_p5, %p60_p3  ;;  %s134_s25 = ssub.s32 %s819_s18, %s1134_s22 }
  0x12   : > { %p135_p7 = scmp.eq.s32.totalorder %s134_s25, 0  ;;  %s137_s26 = sadd.s32 1, %s803_s14 }
  0x13   : > { %s1110_s24 = scalar_select %p904_p6, 1, 0 }
  0x14   : > { %s912_s27 = scalar_select %p135_p7, %s803_s14, %s137_s26  }
  0x15   : > { %p147_p8 = scmp.ne.s32.totalorder %s803_s14, %s799_s13  ;;  %p148_p9 = scmp.eq.s32.totalorder %s890_s20, 1 }
  0x16   : > { %1111 = sst [smem:[#allocation15_spill]] %s912_s27  ;;  %p153_p10 = scmp.ne.s32.totalorder %s799_s13, %s795_s12 }
  0x17   : > { %p154_p11 = scmp.eq.s32.totalorder %s499_s21, 1  ;;  %p919_p12 = por %p148_p9, %p147_p8 }
  0x18   : > { %p546_p1 = scmp.lt.s32.totalorder %s823_s19, 2  ;;  %s198_s4 = sand.u32 1, %s823_s19  }
  0x19   : > { %s1112_s28 = scalar_select %p919_p12, 1, 0 }
  0x1a   : > { %p924_p0 = por %p154_p11, %p153_p10  ;;  %p931_p2 = pnand %p546_p1, %p899_p4 }
  0x1b   : > { %s825_s5 = smov [#allocation6]   ;;  %s939_s7 = scalar_lea.sflag [#allocation7], %s198_s4 }
  0x1c   : > { %s1113_s29 = scalar_select %p924_p0, 1, 0 }
  0x1d   : > { %s1114_s30 = scalar_select %p931_p2, 1, 0 }
  0x1e   : > { %s212_s6 = sshll.u32 %s825_s5, 4  ;;  %s1115_s1 = sld [smem:[#allocation16_spill]]  ;;  %s936_s6 = int_to_ptr.vmem [resolvable:$true] %s212_s6 }
  0x1f   : > { %p949_p5 = pneg %p931_p2 }
  0x24   : > { %s626_s10 = scalar_lea.hbm %s1115_s1, 256 }
  0x25   : > { %p627_p4 = scmp.ne.s32.totalorder %s1115_s1, %s626_s10  ;;  %p633_p9 = scmp.lt.u32.totalorder %s626_s10, %s626_s10 }
  0x26   : > { %p635_p10 = scmp.lt.u32.totalorder %s626_s10, %s1115_s1 }
  0x27   : > { %p629_p7 = pnand %p949_p5, %p627_p4 }
  0x28   : > { %p636_p11 = por %p635_p10, %p633_p9 }
  0x29   : > { %p630_p8 = pneg %p629_p7 }
  0x2b   : > { %p637_p1 = pnand %p636_p11, %p630_p8 }
  0x2d   : > { %640 = shalt.err (!%p637_p1)
}
  0x2e   : > { %s641_s26 = scalar_lea.vmem %s936_s6, 256  ;;  %s648_s4 = scalar_lea.vmem %s936_s6, 512 }
  0x2f   : > { %p642_p13 = scmp.ne.s32.totalorder %s936_s6, %s641_s26  ;;  %p649_p4 = scmp.lt.s32.totalorder %s936_s6, %s936_s6 }
  0x30   : > { %p650_p7 = scmp.lt.s32.totalorder %s648_s4, %s641_s26 }
  0x31   : > { %p644_p3 = pnand %p642_p13, %p949_p5 }
  0x32   : > { %p651_p12 = por %p650_p7, %p649_p4 }
  0x33   : > { %p645_p0 = pneg %p644_p3 }
  0x35   : > { %p652_p6 = pnand %p651_p12, %p645_p0 }
  0x37   : > { %655 = shalt.err (!%p652_p6)
}
  0x38   : > { %s826_s5 = smov 128   ;;  %s827_s8 = smov 8  }
  0x39   : > { %538 = dma.hbm_to_vmem [thread:$0]  (!%p931_p2), %s1115_s1, 256, %s936_s6, %s939_s7, %s826_s5, %s826_s5, %s827_s8  }
  0x3a   : > { %p244_p13 = scmp.lt.s32.totalorder %s823_s19, 3  ;;  %p1117_p3 = scmp.ge.s32.totalorder %s823_s19, 1 }
  0x3b   : > { %s828_s15 = smov [#allocation3]   ;;  %s656_s4 = scalar_lea.hbm %s1096_s0, 256 }
  0x3c   : > { %p978_p12 = pnand %p1117_p3, %p244_p13  ;;  %s188_s23 = sshll.u32 %s828_s15, 4  ;;  %s189_s23 = int_to_ptr.vmem [resolvable:$true] %s188_s23 }
  0x3d   : > { %p657_p6 = scmp.ne.s32.totalorder %s1096_s0, %s656_s4  ;;  %p663_p9 = scmp.lt.u32.totalorder %s656_s4, %s656_s4 }
  0x3e   : > { %s1118_s11 = scalar_select %p978_p12, 1, 0 }
  0x3f   : > { %p659_p0 = pnand %p657_p6, %p949_p5  ;;  %p665_p10 = scmp.lt.u32.totalorder %s656_s4, %s1096_s0 }
  0x41   : > { %p660_p8 = pneg %p659_p0  ;;  %p666_p11 = por %p665_p10, %p663_p9 }
  0x43   : > { %p667_p1 = pnand %p666_p11, %p660_p8 }
  0x45   : > { %670 = shalt.err (!%p667_p1)
}
  0x46   : > { %s671_s10 = scalar_lea.vmem %s189_s23, 256  ;;  %s678_s15 = scalar_lea.vmem %s189_s23, 512 }
  0x47   : > { %p672_p4 = scmp.ne.s32.totalorder %s189_s23, %s671_s10  ;;  %p679_p3 = scmp.lt.s32.totalorder %s189_s23, %s189_s23 }
  0x48   : > { %p680_p12 = scmp.lt.s32.totalorder %s678_s15, %s671_s10 }
  0x49   : > { %p674_p7 = pnand %p672_p4, %p949_p5 }
  0x4a   : > { %p681_p2 = por %p680_p12, %p679_p3 }
  0x4b   : > { %p675_p13 = pneg %p674_p7 }
  0x4d   : > { %p682_p6 = pnand %p681_p2, %p675_p13 }
  0x4f   : > { %685 = shalt.err (!%p682_p6)
}
  0x50   : > { %p1119_p0 = scmp.ne.s32.totalorder %s1114_s30, 0  ;;  %s829_s25 = smov [#allocation8]  }
  0x51   : > { %s236_s26 = sshll.u32 %s829_s25, 4  ;;  %s686_s9 = scalar_lea.hbm %s1098_s2, 256  ;;  %s237_s26 = int_to_ptr.vmem [resolvable:$true] %s236_s26 }
  0x52   : > { %535 = dma.hbm_to_vmem [thread:$0]  (!%p1119_p0), %s1096_s0, 256, %s189_s23, [#allocation4], %s826_s5, %s826_s5, %s827_s8  }
  0x53   : > { %p687_p2 = scmp.ne.s32.totalorder %s1098_s2, %s686_s9  ;;  %p693_p9 = scmp.lt.u32.totalorder %s686_s9, %s686_s9 }
  0x54   : > { %p695_p10 = scmp.lt.u32.totalorder %s686_s9, %s1098_s2 }
  0x55   : > { %p689_p12 = pnand %p687_p2, %p949_p5 }
  0x56   : > { %p696_p11 = por %p695_p10, %p693_p9 }
  0x57   : > { %p690_p8 = pneg %p689_p12 }
  0x59   : > { %p697_p1 = pnand %p696_p11, %p690_p8 }
  0x5b   : > { %700 = shalt.err (!%p697_p1)
}
  0x5c   : > { %s701_s23 = scalar_lea.vmem %s237_s26, 256  ;;  %s708_s18 = scalar_lea.vmem %s237_s26, 512 }
  0x5d   : > { %p702_p4 = scmp.ne.s32.totalorder %s237_s26, %s701_s23  ;;  %p709_p3 = scmp.lt.s32.totalorder %s237_s26, %s237_s26 }
  0x5e   : > { %p710_p6 = scmp.lt.s32.totalorder %s708_s18, %s701_s23 }
  0x5f   : > { %p704_p7 = pnand %p702_p4, %p949_p5 }
  0x60   : > { %p711_p0 = por %p710_p6, %p709_p3 }
  0x61   : > { %p705_p13 = pneg %p704_p7 }
  0x63   : > { %p712_p2 = pnand %p711_p0, %p705_p13 }
  0x65   : > { %715 = shalt.err (!%p712_p2)
}
  0x66   : > { %p1120_p12 = scmp.ne.s32.totalorder %s1114_s30, 0  ;;  %p1121_p8 = scmp.ne.s32.totalorder %s1118_s11, 0 }
  0x67   : > { %s250_s21 = sand.u32 (!%p1121_p8), 1, %s811_s16   ;;  %p1122_p5 = scmp.ne.s32.totalorder (!%p1121_p8), %s1110_s24, 0 }
  0x68   : > { %541 = dma.hbm_to_vmem [thread:$0]  (!%p1120_p12), %s1098_s2, 256, %s237_s26, %s939_s7, %s826_s5, %s826_s5, %s827_s8  }
  0x69   : > { %248 = sbr.rel (%p1121_p8) target bundleno = 155 (0x9b), region = 32  ;;  %s512_s22 = sshll.u32 (!%p1121_p8), %s250_s21, 4 }
  0x6a   : > { %s251_s25 = scalar_lea.sflag (!%p1121_p8), [#allocation4], %s250_s21  ;;  %s254_s4 = scalar_lea.vmem (!%p1121_p8), [#allocation3], %s512_s22 }
  0x70   : > { %781 = dma.done.wait (%p1122_p5), %s251_s25, 256  }
  0x71   : > { %783 = vsyncadd (%p1122_p5), %s251_s25, 4294967040  ;;  %s259_s30 = sand.u32 1, %s890_s20   ;;  %s263_s9 = scalar_lea.vmem [#allocation6], %s512_s22 }
  0x72   : > { %s260_s6 = scalar_lea.sflag [#allocation7], %s259_s30 }
  0x73   : > { %785 = dma.done.wait (%p1122_p5), %s260_s6, 512  }
  0x74   : > { %787 = vsyncadd (%p1122_p5), %s260_s6, 4294966784  ;;  %s272_s7 = scalar_lea.vmem [#allocation8], %s512_s22  ;;  %v344_v4 = vlaneseq  ;;  %v322_v7 = vld [vmem:[%s254_s4] sm:$0xff]  ;;  %v323_v9 = vld [vmem:[%s254_s4 + $0x8] sm:$0xff]  ;;  %s516_s20 = sshll.u32 %s815_s17, 4 }
  0x75   : > { %v326_v0 = vld [vmem:[%s272_s7] sm:$0xff]  ;;  %v327_v1 = vld [vmem:[%s272_s7 + $0x8] sm:$0xff]  ;;  %s302_s24 = sand.u32 1, %s799_s13   ;;  %v347_v15 = vstv %s516_s20  ;;  %s518_s26 = sshll.u32 %s815_s17, 7 }
  0x76   : > { %v330_v2 = vsub.f32 0.0, %v326_v0  ;;  %v331_v3 = vsub.f32 0.0, %v327_v1  ;;  %v324_v8 = vld [vmem:[%s263_s9] sm:$0xff]  ;;  %v325_v10 = vld [vmem:[%s263_s9 + $0x8] sm:$0xff]  ;;  %v345_v11 = vshrl.u32 %v344_v4, 7  ;;  %s515_s5 = sshll.u32 %s302_s24, 3  ;;  %s1045_s23 = scalar_lea.hbm %s1099_s3, %s518_s26 }
  0x77   : > { %v328_v12 = vsub.f32 %v322_v7, %v324_v8  ;;  %v329_v13 = vsub.f32 %v323_v9, %v325_v10  ;;  %s304_s8 = scalar_lea.vmem [#allocation9], %s515_s5  ;;  %s364_s18 = scalar_lea.sflag [#allocation5], %s302_s24 }
  0x78   : > { %v332_v5 = vmul.f32 1.442695, %v330_v2  ;;  %v334_v6 = vmul.f32 1.442695, %v331_v3  ;;  %v346_v14 = vadd.s32 8, %v345_v11  ;;  %v348_v18 = vadd.s32 %v347_v15, %v345_v11  ;;  %s377_s11 = sshll.u32 %s304_s8, 4  ;;  %s1040_s11 = int_to_ptr.vmem [resolvable:$true] %s377_s11 }
  0x79   : > { %v336_v16 = vmul.f32 %v328_v12, %v328_v12  ;;  %v337_v17 = vmul.f32 %v329_v13, %v329_v13  ;;  %s716_s1 = scalar_lea.vmem %s1040_s11, 128  ;;  %p1123_p9 = scmp.ne.s32.totalorder %s1112_s28, 0 }
  0x7a   : > { %622 = vpow2.f32 %v332_v5  ;;  %v349_v19 = vadd.s32 %v347_v15, %v346_v14  ;;  %vm350_vm0 = vcmp.lt.s32.totalorder %v348_v18, 16  ;;  %p717_p0 = scmp.ne.s32.totalorder %s1040_s11, %s716_s1  ;;  %s830_s17 = smov [#allocation9]  }
  0x7b   : > { %624 = vpow2.f32 %v334_v6  ;;  %s720_s27 = sshll.u32 %s830_s17, 4  ;;  %s721_s27 = int_to_ptr.vmem [resolvable:$false] %s720_s27 }
  0x7c   : > { %vm351_vm1 = vcmp.lt.s32.totalorder %v349_v19, 16  ;;  %p718_p10 = pnand %p717_p0, %p1123_p9  ;;  %s722_s21 = scalar_lea.vmem %s721_s27, 256 }
  0x7d   : > { %p723_p1 = scmp.lt.s32.totalorder %s1040_s11, %s721_s27  ;;  %p724_p4 = scmp.lt.s32.totalorder %s722_s21, %s716_s1 }
  0x7e   : > { %p719_p11 = pneg %p718_p10 }
  0x7f   : > { %p725_p7 = por %p724_p4, %p723_p1 }
  0x81   : > { %p726_p13 = pnand %p725_p7, %p719_p11 }
  0x84   : > { %v623_v20 = vpop.eup %622 }
  0x85   : > { %v625_v21 = vpop.eup %624  ;;  %v338_v22 = vmul.f32 %v623_v20, %v336_v16 }
  0x86   : > { %v339_v23 = vmul.f32 %v625_v21, %v337_v17 }
  0x87   : > { %v340_v24 = vadd.f32 %v338_v22, %v326_v0 }
  0x88   : > { %v341_v25 = vadd.f32 %v339_v23, %v327_v1 }
  0x89   : > { %v352_v26 = vsel %vm350_vm0, %v340_v24, 0.0 }
  0x8a   : > { %v353_v27 = vsel %vm351_vm1, %v341_v25, 0.0 }
  0x8b   : > { %v355_v28 = vadd.f32 %v353_v27, %v352_v26 }
  0x8d   : > { %362 = vst [vmem:[%s304_s8] sm:$0xff] %v355_v28 }
  0x8e   : > { %729 = shalt.err (!%p726_p13)
}
  0x8f   : > { %s730_s22 = scalar_lea.hbm %s1045_s23, 128  ;;  %s734_s30 = scalar_lea.hbm %s1099_s3, 256 }
  0x90   : > { %p731_p3 = scmp.ne.s32.totalorder %s1045_s23, %s730_s22  ;;  %p735_p12 = scmp.lt.u32.totalorder %s1045_s23, %s1099_s3 }
  0x91   : > { %p736_p8 = scmp.lt.u32.totalorder %s734_s30, %s730_s22  ;;  %p738_p0 = scmp.lt.u32.totalorder %s730_s22, %s1045_s23 }
  0x92   : > { %p732_p6 = pnand %p731_p3, %p1123_p9 }
  0x93   : > { %p737_p5 = por %p736_p8, %p735_p12 }
  0x94   : > { %p733_p2 = pneg %p732_p6 }
  0x95   : > { %p739_p10 = por %p738_p0, %p737_p5 }
  0x97   : > { %p740_p11 = pnand %p739_p10, %p733_p2 }
  0x99   : > { %743 = shalt.err (!%p740_p11)
}
  0x9a   : > { %530 = dma.vmem_to_hbm [thread:$0]  (%p1123_p9), %s1040_s11, 128, %s1045_s23, %s364_s18  }
  0x9b PF: > { %s389_s7 = sand.u32 1, %s795_s12   ;;  %p1124_p1 = scmp.ne.s32.totalorder %s1113_s29, 0 }
  0x9c   : > { %p1125_p4 = scmp.ge.s32.totalorder %s823_s19, 2  ;;  %s390_s20 = scalar_lea.sflag [#allocation5], %s389_s7 }
  0x9e   : > { %p543_p7 = pnand %p1125_p4, %p1124_p1 }
  0xa0   : > { %789 = dma.done.wait (!%p543_p7), %s390_s20, 128  }
  0xa1   : > { %791 = vsyncadd (!%p543_p7), %s390_s20, 4294967168  ;;  %s22_s19 = sadd.s32 1, %s823_s19   ;;  %s1126_s28 = sld [smem:[#allocation15_spill]] }
  0xa2   : > { %p19_p13 = scmp.ge.s32.totalorder %s22_s19, 4   ;;  %s1127_s17 = sld [smem:[#allocation13_spill]] }
  0xa3   : > { %s1128_s18 = sld [smem:[#allocation14_spill]]  ;;  %s1129_s12 = smov %s799_s13 }
  0xa4   : > { %s1130_s13 = smov %s803_s14  ;;  %s1132_s15 = smov %s811_s16 }
  0xa5   : > { %s1086_s16 = smov 0   ;;  %21 = sbr.rel (!%p19_p13) target bundleno = 11 (0xb), region = 109 }
  0xa7   : > { %s1131_s14 = smov %s1126_s28 }
  0xac   :  { %395 = vsyncpa [#allocation4], 1 }
  0xad   :  { %397 = vsyncpa [#allocation4 + $0x1], 1 }
  0xae   :  { %398 = vsyncpa [#allocation7], 1 }
  0xaf   :  { %400 = vsyncpa [#allocation7 + $0x1], 1 }
  0xb0   :  { %401 = vsyncpa [#allocation5], 1 }
  0xb1   :  { %403 = vsyncpa [#allocation5 + $0x1], 1 }

</bundles_post_ra>
